<compile_context>
chip_gen: v6e
topology: v6e:2x2x1
jax: 0.10.0
libtpu: 0.0.40
codegen_flags: <defaults>
</compile_context>

<pallas_src>
import functools

import jax
import jax.numpy as jnp
from jax.experimental import pallas as pl
from jax.experimental.pallas import tpu as pltpu

CHANNELS = {"ViT-L/14": 768}


def _fc_kernel(x_ref, w_ref, b_ref, o_ref):
    # x_ref: (tb, D) features      w_ref: (Cp, D) weight (lane-major, as nn.Linear)
    # b_ref: (Cp, 1) f32 bias      o_ref: (1, Cp, tb) f32 output (batch on lane axis)
    logits = jax.lax.dot_general(
        w_ref[...], x_ref[...],
        dimension_numbers=(((1,), (1,)), ((), ())),   # contract both on D  ==  w @ x.T
        preferred_element_type=jnp.float32,            # f32 MXU accumulation
    )
    o_ref[0] = logits + b_ref[...]                     # bias fused in-kernel


def _round_up(n, m):
    return ((n + m - 1) // m) * m


def _cdiv(a, b):
    return -(-a // b)


@functools.partial(jax.jit, static_argnames=("block_b",))
def clip_fc_forward(x, w, b, *, block_b=2048):
    """CLIPModel.forward default branch: fc(x) on precomputed CLIP features.

    x: (B, D) features, w: (C, D) nn.Linear weight, b: (C,) bias. Returns (B, C) f32.
    """
    assert block_b % 8 == 0
    B, D = x.shape
    C, D2 = w.shape
    assert D == D2 and b.shape == (C,)

    # Pad the tiny classifier params to a sublane multiple (zero rows -> zero logits,
    # sliced off below).  ~Cp*D*4 bytes of traffic, negligible vs the x stream.
    Cp = _round_up(C, 8)
    wp = w.astype(x.dtype)            # match x's dtype for the MXU (f32 by default)
    bp = b.astype(jnp.float32)
    if Cp != C:
        wp = jnp.pad(wp, ((0, Cp - C), (0, 0)))
        bp = jnp.pad(bp, ((0, Cp - C),))
    bp = bp.reshape(Cp, 1)

    # Batch tiling.
    #  * single tile : tb == B, no padding and NO copy of x at all.
    #  * multi tile  : tb rounded to a multiple of 8 only (waste <= ~8*n_tiles rows);
    #                  >= 2 tiles once B >= 1024 so the "parallel" grid axis is split
    #                  across both v7x TensorCores.
    n_tiles = max(1, _cdiv(B, block_b))
    if n_tiles == 1 and B >= 1024:
        n_tiles = 2
    if n_tiles == 1:
        tb, b_pad = B, B
        xp = x
    else:
        tb = _round_up(_cdiv(B, n_tiles), 8)
        b_pad = n_tiles * tb
        # TODO(synk): for B not divisible by 8*n_tiles this pad still materializes one
        # copy of x; pltpu.CompilerParams(allow_input_fusion=...) could fuse it away.
        xp = x if b_pad == B else jnp.pad(x, ((0, b_pad - B), (0, 0)))

    cost = pl.CostEstimate(
        flops=2 * b_pad * D * Cp,
        transcendentals=0,
        bytes_accessed=(b_pad * D * xp.dtype.itemsize      # features (dominant stream)
                        + Cp * D * wp.dtype.itemsize       # weight (resident)
                        + Cp * 4                            # bias
                        + n_tiles * Cp * tb * 4),           # lane-dense f32 output
    )

    y = pl.pallas_call(
        _fc_kernel,
        out_shape=jax.ShapeDtypeStruct((n_tiles, Cp, tb), jnp.float32),
        grid=(n_tiles,),
        in_specs=[
            pl.BlockSpec((tb, D), lambda i: (i, 0)),       # x tile, double-buffered
            pl.BlockSpec((Cp, D), lambda i: (0, 0)),       # weight resident across grid
            pl.BlockSpec((Cp, 1), lambda i: (0, 0)),       # bias resident across grid
        ],
        out_specs=pl.BlockSpec((1, Cp, tb), lambda i: (i, 0, 0)),
        compiler_params=pltpu.CompilerParams(
            dimension_semantics=("parallel",),             # independent batch tiles
            vmem_limit_bytes=32 * 1024 * 1024,             # 12 MiB x double-buffer + out
        ),
        cost_estimate=cost,
    )(xp, wp, bp)

    # (n_tiles, Cp, tb) -> (B, C): tiny layout fixup (b_pad * Cp * 4 bytes).
    y = jnp.transpose(y, (0, 2, 1)).reshape(b_pad, Cp)
    return y[:B, :C]


class CLIPModelPallas:
    """Mirrors CLIPModel: holds fc params; forward() dispatches like the PyTorch module."""

    def __init__(self, name="ViT-L/14", num_classes=1, key=None):
        d = CHANNELS[name]
        if key is None:
            key = jax.random.PRNGKey(0)
        kw, kb = jax.random.split(key)
        # Deterministic init matching nn.Linear's U(-1/sqrt(in), 1/sqrt(in)) shape/scale.
        bound = 1.0 / (d ** 0.5)
        self.fc_w = jax.random.uniform(kw, (num_classes, d), jnp.float32, -bound, bound)
        self.fc_b = jax.random.uniform(kb, (num_classes,), jnp.float32, -bound, bound)

    def forward(self, x, return_feature=False, return_all=False):
        if return_feature or return_all:
            # TODO(synk): encode_image (full pretrained CLIP ViT via clip.load) has no
            # in-script equivalent without loading a checkpoint.
            raise NotImplementedError("encode_image path not implemented")
        return clip_fc_forward(x, self.fc_w, self.fc_b)


if __name__ == "__main__":
    key = jax.random.PRNGKey(0)
    k_x, k_p, k_x2 = jax.random.split(key, 3)

    D = CHANNELS["ViT-L/14"]
    model = CLIPModelPallas("ViT-L/14", num_classes=1, key=k_p)

    # Small shape consistent with the module: batch=2 precomputed CLIP features (768-d).
    x = jax.random.normal(k_x, (2, D), dtype=jnp.float32)
    y = jax.block_until_ready(model.forward(x))
    assert y.shape == (2, 1)

    # Exact elementwise-sum reference (no MXU); loose tolerance covers MXU pass rounding.
    y_ref = jnp.sum(x[:, None, :] * model.fc_w[None, :, :], axis=-1) + model.fc_b[None, :]
    assert jnp.allclose(y, y_ref, atol=1e-2, rtol=1e-2)

    # Multi-tile / awkward-batch path (exercises grid, minimal padding, both-TC split).
    x2 = jax.random.normal(k_x2, (1030, D), dtype=jnp.float32)
    y2 = jax.block_until_ready(model.forward(x2))
    assert y2.shape == (1030, 1)
    y2_ref = jnp.sum(x2[:, None, :] * model.fc_w[None, :, :], axis=-1) + model.fc_b[None, :]
    assert jnp.allclose(y2, y2_ref, atol=1e-2, rtol=1e-2)

    print("KERNEL_OK")
</pallas_src>

<mosaic_0001>
module attributes {stable_mosaic.version = 11 : i64} {
  func.func @_fc_kernel(%arg0: i32, %arg1: memref<2x768xf32, #tpu.memory_space<vmem>>, %arg2: memref<8x768xf32, #tpu.memory_space<vmem>>, %arg3: memref<8x1xf32, #tpu.memory_space<vmem>>, %arg4: memref<1x8x2xf32, #tpu.memory_space<vmem>>) attributes {dimension_semantics = [#tpu.dimension_semantics<parallel>], iteration_bounds = array<i64: 1>, scalar_prefetch = 0 : i64, scratch_operands = 0 : i64, tpu.core_type = #tpu.core_type<tc>, window_params = [{transform_indices = @transform_0, window_bounds = array<i64: 2, 768>}, {pipeline_mode = #tpu.pipeline_mode<synchronous>, transform_indices = @transform_1, window_bounds = array<i64: 8, 768>}, {pipeline_mode = #tpu.pipeline_mode<synchronous>, transform_indices = @transform_2, window_bounds = array<i64: 8, 1>}, {transform_indices = @transform_3, window_bounds = array<i64: 1, 8, 2>}]} {
    %c0 = arith.constant 0 : index
    %c0_0 = arith.constant 0 : index
    %0 = vector.load %arg2[%c0, %c0_0] : memref<8x768xf32, #tpu.memory_space<vmem>>, vector<8x768xf32>
    %c0_1 = arith.constant 0 : index
    %c0_2 = arith.constant 0 : index
    %1 = vector.load %arg1[%c0_1, %c0_2] : memref<2x768xf32, #tpu.memory_space<vmem>>, vector<2x768xf32>
    %cst = arith.constant dense<0.000000e+00> : vector<8x2xf32>
    %2 = tpu.matmul %0, %1, %cst {dimension_numbers = #tpu.dot_dimension_numbers<[1], [1], [0], [0], [0, 0, 1, 0], [], []>} : vector<8x768xf32>, vector<2x768xf32>, vector<8x2xf32> -> vector<8x2xf32>
    %c0_3 = arith.constant 0 : index
    %c0_4 = arith.constant 0 : index
    %3 = vector.load %arg3[%c0_3, %c0_4] : memref<8x1xf32, #tpu.memory_space<vmem>>, vector<8x1xf32>
    %4 = vector.broadcast %3 : vector<8x1xf32> to vector<8x2xf32>
    %5 = arith.addf %2, %4 : vector<8x2xf32>
    %c0_5 = arith.constant 0 : index
    %c0_6 = arith.constant 0 : index
    %c0_7 = arith.constant 0 : index
    %6 = vector.load %arg4[%c0_5, %c0_6, %c0_7] : memref<1x8x2xf32, #tpu.memory_space<vmem>>, vector<1x8x2xf32>
    %7 = vector.shape_cast %6 : vector<1x8x2xf32> to vector<8x2xf32>
    %8 = vector.shape_cast %5 : vector<8x2xf32> to vector<1x8x2xf32>
    tpu.vector_store %arg4[%c0_5, %c0_6, %c0_7], %8 {strides = array<i32>} : memref<1x8x2xf32, #tpu.memory_space<vmem>>, vector<1x8x2xf32>,
    return
  }
  func.func @transform_0(%arg0: i32) -> (i32, i32) {
    %c0_i32 = arith.constant 0 : i32
    %c0_i32_0 = arith.constant 0 : i32
    return %arg0, %c0_i32 : i32, i32
  }
  func.func @transform_1(%arg0: i32) -> (i32, i32) {
    %c0_i32 = arith.constant 0 : i32
    %c0_i32_0 = arith.constant 0 : i32
    %c0_i32_1 = arith.constant 0 : i32
    return %c0_i32, %c0_i32_0 : i32, i32
  }
  func.func @transform_2(%arg0: i32) -> (i32, i32) {
    %c0_i32 = arith.constant 0 : i32
    %c0_i32_0 = arith.constant 0 : i32
    %c0_i32_1 = arith.constant 0 : i32
    return %c0_i32, %c0_i32_0 : i32, i32
  }
  func.func @transform_3(%arg0: i32) -> (i32, i32, i32) {
    %c0_i32 = arith.constant 0 : i32
    %c0_i32_0 = arith.constant 0 : i32
    %c0_i32_1 = arith.constant 0 : i32
    return %arg0, %c0_i32, %c0_i32_0 : i32, i32, i32
  }
}

</mosaic_0001>

<bundles_post_ra>
// kernel: clip_fc_forward.1
= control target key start
LH: loop header
LB: loop body
LE: loop exit
PB: predicated region body
PF: predicated region fallthrough
CT: control target
= control target key end

     0   :  { %v34_v0 = vlaneseq  ;;  %v282_v2 = vmov 1983009808   ;;  %v283_v5 = vmov 0   ;;  %vm271_vm0 = vcmask 15360   ;;  %s334_s0 = inlined_call_operand.vmem [shape: f32[2,768], index: 0, kind: input, shape index: {}]   ;;  %s335_s1 = inlined_call_operand.vmem [shape: f32[8,768], index: 1, kind: input, shape index: {}]   ;;  %s336_s2 = inlined_call_operand.vmem [shape: f32[8,1], index: 2, kind: input, shape index: {}]   ;;  %s337_s3 = inlined_call_operand.vmem [shape: f32[1,8,2], index: 3, kind: output, shape index: {}]  }
   0x1   :  { %v20_v1 = vld [vmem:[%s334_s0] sm:$0xff]  ;;  %v32_v3 = vunpack.c.l.s4 %v282_v2  ;;  %v15_v4 = vld [vmem:[%s335_s1 + $0x8] sm:$0xff]  ;;  %280 = vset.pattern.permute.xlu0 %v283_v5  ;;  %v17_v7 = vld [vmem:[%s335_s1 + $0x18] sm:$0xff] }
   0x2   :  { %v35_v6 = vshrl.u32 %v34_v0, 7  ;;  %125 = vmatprep.mubr.f32.mxu0 %v15_v4  ;;  %v30_v9 = vcombine.high %v20_v1, %v20_v1  ;;  %195 = vmatprep.mubr.f32.mxu1 %v17_v7  ;;  %v22_v10 = vld [vmem:[%s336_s2] sm:$0xff]  ;;  %v277_v12 = vld.sshfl [vmem:[%s334_s0 + $0x8] sm:$0x33 pattern:$0x76325410] }
   0x3   :  { %v33_v8 = vunpack.c.0.s8 %v32_v3  ;;  %25 = vperm.xlu0 %280, %v22_v10   ;;  %v54_v17 = vcombine.high %v277_v12, %v277_v12  ;;  %v14_v18 = vld [vmem:[%s335_s1] sm:$0xff]  ;;  %v16_v19 = vld [vmem:[%s335_s1 + $0x10] sm:$0xff]  ;;  %v19_v20 = vld [vmem:[%s335_s1 + $0x28] sm:$0xff] }
   0x4   :  { %v18_v21 = vld [vmem:[%s335_s1 + $0x20] sm:$0xff] }
   0x5   :  { %v36_v11 = vsub.s32 %v33_v8, %v35_v6 }
   0x7   :  { %v37_v13 = vrot.slane %v20_v1, %v36_v11  ;;  %v44_v14 = vrot.slane %v30_v9, %v36_v11 }
   0x9   :  { %v45_v15 = vcombine.high %v37_v13, %v37_v13  ;;  %v46_v16 = vcombine.high %v44_v14, %v44_v14 }
   0xb   :  { %91 = vmatprep.subr.mxu0 %v45_v15  ;;  %161 = vmatprep.subr.mxu1 %v46_v16 }
   0xc   :  { %92 = vmatpush1.xpose.msra.mxu0 %v37_v13  ;;  %162 = vmatpush1.xpose.msra.mxu1 %v44_v14 }
   0xd   :  { %231 = vmatprep.subr.mxu0 %v54_v17 }
   0xf   :  { %126 = vmatmul.mubr.f32.vlgmr.msra.gmra.mxu0 %v14_v18  ;;  %196 = vmatmul.mubr.f32.vlgmr.msra.gmra.mxu1 %v16_v19 }
  0x10   :  { %232 = vmatpush1.xpose.msra.mxu0 %v277_v12  ;;  %265 = vmatprep.mubr.f32.mxu0 %v19_v20 }
  0x13   :  { %266 = vmatmul.mubr.f32.vlgmr.msra.gmra.mxu0 %v18_v21 }
  0x7e   :  { %v26_v22 = vpop.permute.xlu0 %25 }
  0xcf   :  { %v127_v23 = vpop.f32.mrf.mxu0  ;;  %v197_v24 = vpop.f32.mrf.mxu1 }
  0xd0   :  { %v128_v25 = vadd.f32 %v127_v23, %v26_v22 }
  0xd1   :  { %v129_v26 = vpop.f32.mrf.mxu0  ;;  %v199_v27 = vpop.f32.mrf.mxu1 }
  0xd2   :  { %v198_v28 = vadd.f32 %v197_v24, %v128_v25 }
  0xd3   :  { %v267_v29 = vpop.f32.mrf.mxu0 }
  0xd4   :  { %v268_v30 = vadd.f32 %v267_v29, %v198_v28 }
  0xd5   :  { %v269_v31 = vpop.f32.mrf.mxu0 }
  0xd6   :  { %272 = vst.msk [vmem:[%s337_s3] sm:$0xff] %vm271_vm0, %v268_v30 }

</bundles_post_ra>
